<compile_context>
chip_gen: v5e
topology: v5e:2x2
jax: 0.10.0
libtpu: 0.0.40
codegen_flags: <defaults>
</compile_context>

<pallas_src>
import functools

import numpy as np
import jax
import jax.numpy as jnp
from jax.experimental import pallas as pl
from jax.experimental.pallas import tpu as pltpu


def _round_up(x, m):
    return ((x + m - 1) // m) * m


def _make_nme2d_kernel(batch, batch_pad, n_true, tile_n):
    """Build the kernel with static batch / padded-batch / counts / tile."""

    inv_n = 1.0 / float(n_true)
    inv_b = 1.0 / float(batch)

    def kernel(data_ref, out_ref, s_dist, s_minx, s_maxx, s_miny, s_maxy):
        k = pl.program_id(0)

        @pl.when(k == 0)
        def _init():
            s_dist[...] = jnp.zeros_like(s_dist)
            s_minx[...] = jnp.full_like(s_minx, jnp.inf)
            s_maxx[...] = jnp.full_like(s_maxx, -jnp.inf)
            s_miny[...] = jnp.full_like(s_miny, jnp.inf)
            s_maxy[...] = jnp.full_like(s_maxy, -jnp.inf)

        # Per-plane, sublane-aligned views of the (4, B_pad, TN) block.
        gt_x = data_ref[0].astype(jnp.float32)          # (B_pad, TN)
        gt_y = data_ref[1].astype(jnp.float32)
        pr_x = data_ref[2].astype(jnp.float32)
        pr_y = data_ref[3].astype(jnp.float32)

        # Lane-validity mask for this tile (only the sum needs it: padded
        # lanes duplicate a real point, so min/max are unaffected).
        col = jax.lax.broadcasted_iota(jnp.int32, (batch_pad, tile_n), 1)
        valid = (k * tile_n + col) < n_true

        dx = pr_x - gt_x
        dy = pr_y - gt_y
        norm = jnp.where(valid, jnp.sqrt(dx * dx + dy * dy), 0.0)
        s_dist[...] += jnp.sum(norm, axis=1, keepdims=True)

        s_minx[...] = jnp.minimum(s_minx[...],
                                  jnp.min(gt_x, axis=1, keepdims=True))
        s_maxx[...] = jnp.maximum(s_maxx[...],
                                  jnp.max(gt_x, axis=1, keepdims=True))
        s_miny[...] = jnp.minimum(s_miny[...],
                                  jnp.min(gt_y, axis=1, keepdims=True))
        s_maxy[...] = jnp.maximum(s_maxy[...],
                                  jnp.max(gt_y, axis=1, keepdims=True))

        @pl.when(k == pl.num_programs(0) - 1)
        def _finalize():
            dist = s_dist[...] * inv_n                                 # (B_pad, 1)
            bbox = jnp.sqrt((s_maxx[...] - s_minx[...]) *
                            (s_maxy[...] - s_miny[...]))               # (B_pad, 1)
            row = jax.lax.broadcasted_iota(jnp.int32, (batch_pad, 1), 0)
            nme = jnp.where(row < batch, dist / bbox, 0.0)
            out_ref[...] = jnp.reshape(jnp.sum(nme) * inv_b, (1, 1))

    return kernel


@functools.partial(
    jax.jit,
    static_argnames=("n_true", "tile_n", "num_tiles", "batch_pad", "sorted_idx"))
def _nme2d_device(y_true, y_pred, idx, *, n_true, tile_n, num_tiles,
                  batch_pad, sorted_idx):
    B, C, H, W = y_true.shape
    dtype = jnp.promote_types(y_true.dtype, y_pred.dtype)

    # Gather straight from the (free) reshape of the inputs, channels 0:2
    # only — no full-plane concat, no post-gather pad (idx is already padded).
    yt = y_true.astype(dtype).reshape(B, C, H * W)[:, :2]
    yp = y_pred.astype(dtype).reshape(B, C, H * W)[:, :2]
    gt = jnp.take(yt, idx, axis=2, indices_are_sorted=sorted_idx)      # (B, 2, n_pad)
    pr = jnp.take(yp, idx, axis=2, indices_are_sorted=sorted_idx)      # (B, 2, n_pad)

    # (4, B_pad, n_pad) slab: plane 0 = gt_x, 1 = gt_y, 2 = pred_x, 3 = pred_y.
    slab = jnp.stack([gt[:, 0], gt[:, 1], pr[:, 0], pr[:, 1]], axis=0)
    if batch_pad != B:
        slab = jnp.pad(slab, ((0, 0), (0, batch_pad - B), (0, 0)))

    kernel = _make_nme2d_kernel(B, batch_pad, n_true, tile_n)

    # NOTE: a second "parallel" grid axis over batch-row groups would let
    # v7x's two TensorCores split the work, but it adds ~0.35 us/step serial
    # overhead on v5e/v6e for this DMA-bound kernel, so it is left out.
    out = pl.pallas_call(
        kernel,
        out_shape=jax.ShapeDtypeStruct((1, 1), jnp.float32),
        grid=(num_tiles,),
        in_specs=[pl.BlockSpec((4, batch_pad, tile_n), lambda k: (0, 0, k))],
        out_specs=pl.BlockSpec((1, 1), lambda k: (0, 0)),
        scratch_shapes=[pltpu.VMEM((batch_pad, 1), jnp.float32)] * 5,
        compiler_params=pltpu.CompilerParams(
            dimension_semantics=("arbitrary",)),
    )(slab)
    return out[0, 0]


def nme2d_loss(y_true, y_pred, foreface_ind, *, tile_n=2048):
    """JAX/Pallas equivalent of NME2D.forward.

    `foreface_ind` is a host (numpy) (N, 2) integer array of [row, col]
    indices (the module's global).  The module's `face_mask` is never read by
    forward, so it is not an argument.
    """
    B, C, H, W = y_true.shape
    assert C >= 2, "needs at least x/y channels"

    fi = np.asarray(foreface_ind)
    n_true = int(fi.shape[0])
    assert n_true > 0, "foreface_ind must contain at least one point"

    flat_idx = fi[:, 0].astype(np.int64) * W + fi[:, 1].astype(np.int64)
    sorted_idx = bool(np.all(np.diff(flat_idx) >= 0)) if n_true > 1 else True

    # Lane-tile size: up to `tile_n`, 128-aligned, covering n_true exactly
    # once padded.
    tn = _round_up(min(int(tile_n), n_true), 128)
    n_pad = _round_up(n_true, tn)
    num_tiles = n_pad // tn

    # Pad the *index* vector with a real (already-used) face index: the gather
    # emits a lane-aligned array directly, and padded lanes hold a duplicated
    # real point (so min/max need no masking in the kernel).  Padding with the
    # last index keeps the vector sorted.
    idx_pad = np.concatenate(
        [flat_idx, np.full(n_pad - n_true, flat_idx[-1], dtype=np.int64)])
    idx = jnp.asarray(idx_pad, dtype=jnp.int32)

    batch_pad = _round_up(B, 8)
    return _nme2d_device(y_true, y_pred, idx,
                         n_true=n_true, tile_n=tn, num_tiles=num_tiles,
                         batch_pad=batch_pad, sorted_idx=sorted_idx)


# ----------------------------------------------------------------------------
# Pure-JAX reference mirroring the PyTorch forward (for verification).
# ----------------------------------------------------------------------------
def nme2d_ref(y_true, y_pred, foreface_ind):
    fi = jnp.asarray(np.asarray(foreface_ind), dtype=jnp.int32)
    pred = y_pred[:, :, fi[:, 0], fi[:, 1]].astype(jnp.float32)     # (B, C, N)
    gt = y_true[:, :, fi[:, 0], fi[:, 1]].astype(jnp.float32)

    # Per-sample z-centering from the torch code (no effect on the result,
    # reproduced only for fidelity).
    if pred.shape[1] > 2:
        pred = pred.at[:, 2].add(-jnp.mean(pred[:, 2], axis=1, keepdims=True))
        gt = gt.at[:, 2].add(-jnp.mean(gt[:, 2], axis=1, keepdims=True))

    dist = jnp.mean(
        jnp.sqrt(jnp.sum((pred[:, :2] - gt[:, :2]) ** 2, axis=1)), axis=1)
    left = jnp.min(gt[:, 0, :], axis=1)
    right = jnp.max(gt[:, 0, :], axis=1)
    top = jnp.min(gt[:, 1, :], axis=1)
    bottom = jnp.max(gt[:, 1, :], axis=1)
    bbox = jnp.sqrt((right - left) * (bottom - top))
    return jnp.mean(dist / bbox)


if __name__ == "__main__":
    def make_face_region(H, W, ry, rx):
        yy, xx = np.meshgrid(np.arange(H), np.arange(W), indexing="ij")
        cy, cx = (H - 1) / 2.0, (W - 1) / 2.0
        return (((yy - cy) / ry) ** 2 + ((xx - cx) / rx) ** 2) <= 1.0

    key = jax.random.PRNGKey(0)
    # Second config forces tile_n < n_true, exercising the multi-tile
    # (grid-accumulated) path of the kernel.
    configs = [
        # (B, C, H,  W,  ry,   rx,   tile_n)
        (2, 3, 16, 16, 6.0, 5.0, 2048),
        (2, 3, 32, 32, 12.0, 10.0, 128),
    ]
    for (B, C, H, W, ry, rx, tile_n) in configs:
        region = make_face_region(H, W, ry, rx)
        face_mask_np = region.astype(np.float32)   # module fidelity: unused by forward
        foreface_ind = np.argwhere(region).astype(np.int32)   # (N, 2) [row, col]

        key, k_true, k_pred = jax.random.split(key, 3)
        y_true = jax.random.normal(k_true, (B, C, H, W), dtype=jnp.float32)
        y_pred = jax.random.normal(k_pred, (B, C, H, W), dtype=jnp.float32)

        loss = jax.block_until_ready(
            nme2d_loss(y_true, y_pred, foreface_ind, tile_n=tile_n))
        loss_ref = jax.block_until_ready(nme2d_ref(y_true, y_pred, foreface_ind))

        if not np.allclose(np.asarray(loss), np.asarray(loss_ref),
                           rtol=1e-5, atol=1e-5):
            raise AssertionError(
                f"mismatch (B={B},H={H},W={W}): kernel={float(loss)} "
                f"ref={float(loss_ref)}")

    print("KERNEL_OK")
</pallas_src>

<mosaic_0001>
module attributes {stable_mosaic.version = 11 : i64} {
  func.func @kernel(%arg0: i32, %arg1: memref<4x8x128xf32, #tpu.memory_space<vmem>>, %arg2: memref<1x1xf32, #tpu.memory_space<vmem>>, %arg3: memref<8x1xf32, #tpu.memory_space<vmem>>, %arg4: memref<8x1xf32, #tpu.memory_space<vmem>>, %arg5: memref<8x1xf32, #tpu.memory_space<vmem>>, %arg6: memref<8x1xf32, #tpu.memory_space<vmem>>, %arg7: memref<8x1xf32, #tpu.memory_space<vmem>>) attributes {dimension_semantics = [#tpu.dimension_semantics<arbitrary>], iteration_bounds = array<i64: 1>, scalar_prefetch = 0 : i64, scratch_operands = 5 : i64, tpu.core_type = #tpu.core_type<tc>, window_params = [{transform_indices = @transform_0, window_bounds = array<i64: 4, 8, 128>}, {pipeline_mode = #tpu.pipeline_mode<synchronous>, transform_indices = @transform_1, window_bounds = array<i64: 1, 1>}]} {
    %c0_i32 = arith.constant 0 : i32
    %0 = arith.cmpi eq, %arg0, %c0_i32 : i32
    %1 = arith.extui %0 : i1 to i32
    %c0_i32_0 = arith.constant 0 : i32
    %2 = arith.cmpi ne, %1, %c0_i32_0 : i32
    scf.if %2 {
      %cst_36 = arith.constant 0.000000e+00 : f32
      %53 = vector.broadcast %cst_36 : f32 to vector<8x1xf32>
      %c0_37 = arith.constant 0 : index
      %c0_38 = arith.constant 0 : index
      %54 = vector.load %arg3[%c0_37, %c0_38] : memref<8x1xf32, #tpu.memory_space<vmem>>, vector<8x1xf32>
      tpu.vector_store %arg3[%c0_37, %c0_38], %53 {strides = array<i32>} : memref<8x1xf32, #tpu.memory_space<vmem>>, vector<8x1xf32>,
      %cst_39 = arith.constant 0x7F800000 : f32
      %55 = vector.broadcast %cst_39 : f32 to vector<8x1xf32>
      %c0_40 = arith.constant 0 : index
      %c0_41 = arith.constant 0 : index
      %56 = vector.load %arg4[%c0_40, %c0_41] : memref<8x1xf32, #tpu.memory_space<vmem>>, vector<8x1xf32>
      tpu.vector_store %arg4[%c0_40, %c0_41], %55 {strides = array<i32>} : memref<8x1xf32, #tpu.memory_space<vmem>>, vector<8x1xf32>,
      %cst_42 = arith.constant 0xFF800000 : f32
      %57 = vector.broadcast %cst_42 : f32 to vector<8x1xf32>
      %c0_43 = arith.constant 0 : index
      %c0_44 = arith.constant 0 : index
      %58 = vector.load %arg5[%c0_43, %c0_44] : memref<8x1xf32, #tpu.memory_space<vmem>>, vector<8x1xf32>
      tpu.vector_store %arg5[%c0_43, %c0_44], %57 {strides = array<i32>} : memref<8x1xf32, #tpu.memory_space<vmem>>, vector<8x1xf32>,
      %cst_45 = arith.constant 0x7F800000 : f32
      %59 = vector.broadcast %cst_45 : f32 to vector<8x1xf32>
      %c0_46 = arith.constant 0 : index
      %c0_47 = arith.constant 0 : index
      %60 = vector.load %arg6[%c0_46, %c0_47] : memref<8x1xf32, #tpu.memory_space<vmem>>, vector<8x1xf32>
      tpu.vector_store %arg6[%c0_46, %c0_47], %59 {strides = array<i32>} : memref<8x1xf32, #tpu.memory_space<vmem>>, vector<8x1xf32>,
      %cst_48 = arith.constant 0xFF800000 : f32
      %61 = vector.broadcast %cst_48 : f32 to vector<8x1xf32>
      %c0_49 = arith.constant 0 : index
      %c0_50 = arith.constant 0 : index
      %62 = vector.load %arg7[%c0_49, %c0_50] : memref<8x1xf32, #tpu.memory_space<vmem>>, vector<8x1xf32>
      tpu.vector_store %arg7[%c0_49, %c0_50], %61 {strides = array<i32>} : memref<8x1xf32, #tpu.memory_space<vmem>>, vector<8x1xf32>,
    } else {
    }
    %c0 = arith.constant 0 : index
    %c0_1 = arith.constant 0 : index
    %c0_2 = arith.constant 0 : index
    %3 = vector.load %arg1[%c0, %c0_1, %c0_2] : memref<4x8x128xf32, #tpu.memory_space<vmem>>, vector<1x8x128xf32>
    %4 = vector.shape_cast %3 : vector<1x8x128xf32> to vector<8x128xf32>
    %c1 = arith.constant 1 : index
    %c0_3 = arith.constant 0 : index
    %c0_4 = arith.constant 0 : index
    %5 = vector.load %arg1[%c1, %c0_3, %c0_4] : memref<4x8x128xf32, #tpu.memory_space<vmem>>, vector<1x8x128xf32>
    %6 = vector.shape_cast %5 : vector<1x8x128xf32> to vector<8x128xf32>
    %c2 = arith.constant 2 : index
    %c0_5 = arith.constant 0 : index
    %c0_6 = arith.constant 0 : index
    %7 = vector.load %arg1[%c2, %c0_5, %c0_6] : memref<4x8x128xf32, #tpu.memory_space<vmem>>, vector<1x8x128xf32>
    %8 = vector.shape_cast %7 : vector<1x8x128xf32> to vector<8x128xf32>
    %c3 = arith.constant 3 : index
    %c0_7 = arith.constant 0 : index
    %c0_8 = arith.constant 0 : index
    %9 = vector.load %arg1[%c3, %c0_7, %c0_8] : memref<4x8x128xf32, #tpu.memory_space<vmem>>, vector<1x8x128xf32>
    %10 = vector.shape_cast %9 : vector<1x8x128xf32> to vector<8x128xf32>
    %11 = tpu.iota {dimensions = array<i32: 1>} : vector<8x128xi32>
    %c128_i32 = arith.constant 128 : i32
    %12 = arith.muli %arg0, %c128_i32 : i32
    %13 = vector.broadcast %12 : i32 to vector<8x128xi32>
    %14 = arith.addi %13, %11 : vector<8x128xi32>
    %c96_i32 = arith.constant 96 : i32
    %15 = vector.broadcast %c96_i32 : i32 to vector<8x128xi32>
    %16 = arith.cmpi slt, %14, %15 : vector<8x128xi32>
    %17 = arith.subf %8, %4 : vector<8x128xf32>
    %18 = arith.subf %10, %6 : vector<8x128xf32>
    %19 = arith.mulf %17, %17 : vector<8x128xf32>
    %20 = arith.mulf %18, %18 : vector<8x128xf32>
    %21 = arith.addf %19, %20 : vector<8x128xf32>
    %22 = math.sqrt %21 : vector<8x128xf32>
    %cst = arith.constant 0.000000e+00 : f32
    %23 = vector.broadcast %cst : f32 to vector<8x128xf32>
    %24 = arith.select %16, %22, %23 : vector<8x128xi1>, vector<8x128xf32>
    %c0_9 = arith.constant 0 : index
    %c0_10 = arith.constant 0 : index
    %25 = vector.load %arg3[%c0_9, %c0_10] : memref<8x1xf32, #tpu.memory_space<vmem>>, vector<8x1xf32>
    %cst_11 = arith.constant dense<0.000000e+00> : vector<8xf32>
    %26 = vector.multi_reduction <add>, %24, %cst_11 [1] : vector<8x128xf32> to vector<8xf32>
    %27 = vector.shape_cast %26 : vector<8xf32> to vector<8x1xf32>
    %28 = arith.addf %25, %27 : vector<8x1xf32>
    %c0_12 = arith.constant 0 : index
    %c0_13 = arith.constant 0 : index
    %29 = vector.load %arg3[%c0_12, %c0_13] : memref<8x1xf32, #tpu.memory_space<vmem>>, vector<8x1xf32>
    tpu.vector_store %arg3[%c0_12, %c0_13], %28 {strides = array<i32>} : memref<8x1xf32, #tpu.memory_space<vmem>>, vector<8x1xf32>,
    %c0_14 = arith.constant 0 : index
    %c0_15 = arith.constant 0 : index
    %30 = vector.load %arg4[%c0_14, %c0_15] : memref<8x1xf32, #tpu.memory_space<vmem>>, vector<8x1xf32>
    %cst_16 = arith.constant dense<0x7F800000> : vector<8xf32>
    %31 = vector.multi_reduction <minimumf>, %4, %cst_16 [1] : vector<8x128xf32> to vector<8xf32>
    %32 = vector.shape_cast %31 : vector<8xf32> to vector<8x1xf32>
    %33 = arith.minimumf %30, %32 : vector<8x1xf32>
    %c0_17 = arith.constant 0 : index
    %c0_18 = arith.constant 0 : index
    %34 = vector.load %arg4[%c0_17, %c0_18] : memref<8x1xf32, #tpu.memory_space<vmem>>, vector<8x1xf32>
    tpu.vector_store %arg4[%c0_17, %c0_18], %33 {strides = array<i32>} : memref<8x1xf32, #tpu.memory_space<vmem>>, vector<8x1xf32>,
    %c0_19 = arith.constant 0 : index
    %c0_20 = arith.constant 0 : index
    %35 = vector.load %arg5[%c0_19, %c0_20] : memref<8x1xf32, #tpu.memory_space<vmem>>, vector<8x1xf32>
    %cst_21 = arith.constant dense<0xFF800000> : vector<8xf32>
    %36 = vector.multi_reduction <maximumf>, %4, %cst_21 [1] : vector<8x128xf32> to vector<8xf32>
    %37 = vector.shape_cast %36 : vector<8xf32> to vector<8x1xf32>
    %38 = arith.maximumf %35, %37 : vector<8x1xf32>
    %c0_22 = arith.constant 0 : index
    %c0_23 = arith.constant 0 : index
    %39 = vector.load %arg5[%c0_22, %c0_23] : memref<8x1xf32, #tpu.memory_space<vmem>>, vector<8x1xf32>
    tpu.vector_store %arg5[%c0_22, %c0_23], %38 {strides = array<i32>} : memref<8x1xf32, #tpu.memory_space<vmem>>, vector<8x1xf32>,
    %c0_24 = arith.constant 0 : index
    %c0_25 = arith.constant 0 : index
    %40 = vector.load %arg6[%c0_24, %c0_25] : memref<8x1xf32, #tpu.memory_space<vmem>>, vector<8x1xf32>
    %cst_26 = arith.constant dense<0x7F800000> : vector<8xf32>
    %41 = vector.multi_reduction <minimumf>, %6, %cst_26 [1] : vector<8x128xf32> to vector<8xf32>
    %42 = vector.shape_cast %41 : vector<8xf32> to vector<8x1xf32>
    %43 = arith.minimumf %40, %42 : vector<8x1xf32>
    %c0_27 = arith.constant 0 : index
    %c0_28 = arith.constant 0 : index
    %44 = vector.load %arg6[%c0_27, %c0_28] : memref<8x1xf32, #tpu.memory_space<vmem>>, vector<8x1xf32>
    tpu.vector_store %arg6[%c0_27, %c0_28], %43 {strides = array<i32>} : memref<8x1xf32, #tpu.memory_space<vmem>>, vector<8x1xf32>,
    %c0_29 = arith.constant 0 : index
    %c0_30 = arith.constant 0 : index
    %45 = vector.load %arg7[%c0_29, %c0_30] : memref<8x1xf32, #tpu.memory_space<vmem>>, vector<8x1xf32>
    %cst_31 = arith.constant dense<0xFF800000> : vector<8xf32>
    %46 = vector.multi_reduction <maximumf>, %6, %cst_31 [1] : vector<8x128xf32> to vector<8xf32>
    %47 = vector.shape_cast %46 : vector<8xf32> to vector<8x1xf32>
    %48 = arith.maximumf %45, %47 : vector<8x1xf32>
    %c0_32 = arith.constant 0 : index
    %c0_33 = arith.constant 0 : index
    %49 = vector.load %arg7[%c0_32, %c0_33] : memref<8x1xf32, #tpu.memory_space<vmem>>, vector<8x1xf32>
    tpu.vector_store %arg7[%c0_32, %c0_33], %48 {strides = array<i32>} : memref<8x1xf32, #tpu.memory_space<vmem>>, vector<8x1xf32>,
    %c0_i32_34 = arith.constant 0 : i32
    %50 = arith.cmpi eq, %arg0, %c0_i32_34 : i32
    %51 = arith.extui %50 : i1 to i32
    %c0_i32_35 = arith.constant 0 : i32
    %52 = arith.cmpi ne, %51, %c0_i32_35 : i32
    scf.if %52 {
      %c0_36 = arith.constant 0 : index
      %c0_37 = arith.constant 0 : index
      %53 = vector.load %arg3[%c0_36, %c0_37] : memref<8x1xf32, #tpu.memory_space<vmem>>, vector<8x1xf32>
      %cst_38 = arith.constant 0.010416667 : f32
      %54 = vector.broadcast %cst_38 : f32 to vector<8x1xf32>
      %55 = arith.mulf %53, %54 : vector<8x1xf32>
      %c0_39 = arith.constant 0 : index
      %c0_40 = arith.constant 0 : index
      %56 = vector.load %arg5[%c0_39, %c0_40] : memref<8x1xf32, #tpu.memory_space<vmem>>, vector<8x1xf32>
      %c0_41 = arith.constant 0 : index
      %c0_42 = arith.constant 0 : index
      %57 = vector.load %arg4[%c0_41, %c0_42] : memref<8x1xf32, #tpu.memory_space<vmem>>, vector<8x1xf32>
      %58 = arith.subf %56, %57 : vector<8x1xf32>
      %c0_43 = arith.constant 0 : index
      %c0_44 = arith.constant 0 : index
      %59 = vector.load %arg7[%c0_43, %c0_44] : memref<8x1xf32, #tpu.memory_space<vmem>>, vector<8x1xf32>
      %c0_45 = arith.constant 0 : index
      %c0_46 = arith.constant 0 : index
      %60 = vector.load %arg6[%c0_45, %c0_46] : memref<8x1xf32, #tpu.memory_space<vmem>>, vector<8x1xf32>
      %61 = arith.subf %59, %60 : vector<8x1xf32>
      %62 = arith.mulf %58, %61 : vector<8x1xf32>
      %63 = math.sqrt %62 : vector<8x1xf32>
      %64 = tpu.iota {dimensions = array<i32: 0>} : vector<8x1xi32>
      %c2_i32 = arith.constant 2 : i32
      %65 = vector.broadcast %c2_i32 : i32 to vector<8x1xi32>
      %66 = arith.cmpi slt, %64, %65 : vector<8x1xi32>
      %67 = arith.divf %55, %63 : vector<8x1xf32>
      %cst_47 = arith.constant 0.000000e+00 : f32
      %68 = vector.broadcast %cst_47 : f32 to vector<8x1xf32>
      %69 = arith.select %66, %67, %68 : vector<8x1xi1>, vector<8x1xf32>
      %70 = vector.shape_cast %69 : vector<8x1xf32> to vector<1x8x1xf32>
      %cst_48 = arith.constant dense<0.000000e+00> : vector<1xf32>
      %71 = vector.multi_reduction <add>, %70, %cst_48 [1, 2] : vector<1x8x1xf32> to vector<1xf32>
      %72 = vector.shape_cast %71 : vector<1xf32> to vector<1x1x1xf32>
      %73 = vector.extract %72[0, 0, 0] : f32 from vector<1x1x1xf32>
      %cst_49 = arith.constant 5.000000e-01 : f32
      %74 = arith.mulf %73, %cst_49 : f32
      %75 = vector.broadcast %74 : f32 to vector<1x1xf32>
      %c0_50 = arith.constant 0 : index
      %c0_51 = arith.constant 0 : index
      %76 = vector.load %arg2[%c0_50, %c0_51] : memref<1x1xf32, #tpu.memory_space<vmem>>, vector<1x1xf32>
      tpu.vector_store %arg2[%c0_50, %c0_51], %75 {strides = array<i32>} : memref<1x1xf32, #tpu.memory_space<vmem>>, vector<1x1xf32>,
    } else {
    }
    return
  }
  func.func @transform_0(%arg0: i32) -> (i32, i32, i32) {
    %c0_i32 = arith.constant 0 : i32
    %c0_i32_0 = arith.constant 0 : i32
    %c0_i32_1 = arith.constant 0 : i32
    return %c0_i32, %c0_i32_0, %arg0 : i32, i32, i32
  }
  func.func @transform_1(%arg0: i32) -> (i32, i32) {
    %c0_i32 = arith.constant 0 : i32
    %c0_i32_0 = arith.constant 0 : i32
    %c0_i32_1 = arith.constant 0 : i32
    return %c0_i32, %c0_i32_0 : i32, i32
  }
}

</mosaic_0001>

<bundles_post_ra>
// kernel: _nme2d_device.1
= control target key start
LH: loop header
LB: loop body
LE: loop exit
PB: predicated region body
PF: predicated region fallthrough
CT: control target
= control target key end

     0   :  { %s232_s0 = inlined_call_operand.vmem [shape: f32[4,8,128], index: 0, kind: input, shape index: {}]   ;;  %s233_s1 = inlined_call_operand.hbm [shape: f32[1,1], index: 1, kind: output, shape index: {}]  }
   0x1   :  { %v149_v0 = vld [vmem:[%s232_s0 + $0x8] sm:$0xff]  ;;  %v151_v1 = vld [vmem:[%s232_s0 + $0x18] sm:$0xff]  ;;  %v19_v2 = vld [vmem:[%s232_s0] sm:$0xff] }
   0x2   :  { %67 = vmin.xlane.f32.xlu1 %v149_v0  ;;  %v33_v3 = vsub.f32 %v151_v1, %v149_v0  ;;  %v150_v4 = vld [vmem:[%s232_s0 + $0x10] sm:$0xff]  ;;  %57 = vmin.xlane.f32.xlu0 %v19_v2 }
   0x3   :  { %6 = vsyncpa [#allocation8], 0  ;;  %v32_v5 = vsub.f32 %v150_v4, %v19_v2  ;;  %v26_v12 = vlaneseq  ;;  %vm13_vm3 = vcmask 7168   ;;  %v190_v22 = vmov inf   ;;  %s193_s0 = smov [#allocation7]   ;;  %s140_s17 = sshll.u32 %s233_s1, 4  ;;  %s141_s17 = int_to_ptr.hbm [resolvable:$true] %s140_s17 }
   0x4   :  { %v35_v6 = vmul.f32 %v33_v3, %v33_v3  ;;  %17 = vst.msk [vmem:[#allocation5] sm:$0xff] %vm13_vm3, %v190_v22  ;;  %v191_v23 = vmov -inf   ;;  %v192_v26 = vmov 0.0   ;;  %s138_s14 = sshll.u32 %s193_s0, 4  ;;  %vm131_vm11 = vcmask 0   ;;  %s139_s14 = int_to_ptr.vmem [resolvable:$true] %s138_s14 }
   0x5   :  { %v34_v7 = vmul.f32 %v32_v5, %v32_v5  ;;  %v27_v15 = vand.u32 127, %v26_v12  ;;  %15 = vst.msk [vmem:[#allocation3] sm:$0xff] %vm13_vm3, %v190_v22 }
   0x6   :  { %18 = vst.msk [vmem:[#allocation6] sm:$0xff] %vm13_vm3, %v191_v23 }
   0x7   :  { %v36_v8 = vadd.f32 %v35_v6, %v34_v7  ;;  %vm31_vm2 = vcmp.lt.s32.totalorder %v27_v15, 96  ;;  %16 = vst.msk [vmem:[#allocation4] sm:$0xff] %vm13_vm3, %v191_v23 }
   0x8   :  { %14 = vst.msk [vmem:[#allocation2] sm:$0xff] %vm13_vm3, %v192_v26 }
   0x9   :  { %158 = vrsqrt.f32 %v36_v8  ;;  %vm44_vm0 = vcmp.eq.f32.partialorder %v36_v8, inf  ;;  %v47_v17 = vand.u32 2147483648, %v36_v8  ;;  %vm46_vm1 = vcmp.eq.f32.partialorder %v36_v8, 0.0 }
   0xa   :  { %72 = vmax.xlane.f32.xlu1 %v149_v0  ;;  %62 = vmax.xlane.f32.xlu0 %v19_v2  ;;  %v101_v0 = vshrl.u32 %v26_v12, 7 }
   0xb   :  { %v66_v24 = vld [vmem:[#allocation5] sm:$0xff] }
   0xc   :  { %v56_v25 = vld [vmem:[#allocation3] sm:$0xff]  ;;  %vm102_vm10 = vcmp.lt.s32.totalorder %v101_v0, 2 }
   0xd   :  { %v71_v31 = vld [vmem:[#allocation6] sm:$0xff] }
   0xe   :  { %v61_v32 = vld [vmem:[#allocation4] sm:$0xff] }
   0xf   :  { %v159_v9 = vpop.eup %158  ;;  %v50_v44 = vld [vmem:[#allocation2] sm:$0xff] }
  0x10   :  { %v38_v10 = vmul.f32 %v159_v9, %v36_v8 }
  0x12   :  { %v39_v11 = vmul.f32 %v159_v9, %v38_v10 }
  0x14   :  { %v40_v13 = vmul.f32 0.5, %v39_v11 }
  0x16   :  { %v41_v14 = vsub.f32 1.5, %v40_v13 }
  0x18   :  { %v42_v16 = vmul.f32 %v159_v9, %v41_v14 }
  0x1a   :  { %v43_v18 = vmul.f32 %v42_v16, %v36_v8 }
  0x1c   :  { %v45_v19 = vsel %vm44_vm0, %v36_v8, %v43_v18 }
  0x1d   :  { %v48_v20 = vsel %vm46_vm1, %v47_v17, %v45_v19 }
  0x1e   :  { %v49_v21 = vsel %vm31_vm2, %v48_v20, 0.0 }
  0x1f   :  { %51 = vadd.xlane.f32.xlu2 %v49_v21 }
  0x75   :  { %v68_v27 = vpop.xlane.xlu1 %67  ;;  %v58_v28 = vpop.xlane.xlu0 %57 }
  0x76   :  { %v69_v29 = vmin.f32 %v66_v24, %v68_v27  ;;  %v59_v30 = vmin.f32 %v56_v25, %v58_v28 }
  0x78   :  { %70 = vst.msk [vmem:[#allocation5] sm:$0xff] %vm13_vm3, %v69_v29 }
  0x79   :  { %60 = vst.msk [vmem:[#allocation3] sm:$0xff] %vm13_vm3, %v59_v30 }
  0x7d   :  { %v73_v33 = vpop.xlane.xlu1 %72  ;;  %v63_v34 = vpop.xlane.xlu0 %62 }
  0x7e   :  { %v74_v35 = vmax.f32 %v71_v31, %v73_v33  ;;  %v64_v36 = vmax.f32 %v61_v32, %v63_v34 }
  0x7f   :  { %v85_v37 = vld [vmem:[#allocation5] sm:$0xff] }
  0x80   :  { %75 = vst.msk [vmem:[#allocation6] sm:$0xff] %vm13_vm3, %v74_v35  ;;  %v82_v39 = vld [vmem:[#allocation3] sm:$0xff] }
  0x81   :  { %65 = vst.msk [vmem:[#allocation4] sm:$0xff] %vm13_vm3, %v64_v36 }
  0x87   :  { %v84_v38 = vld [vmem:[#allocation6] sm:$0xff] }
  0x88   :  { %v86_v40 = vsub.f32 %v84_v38, %v85_v37  ;;  %v81_v41 = vld [vmem:[#allocation4] sm:$0xff] }
  0x89   :  { %v83_v42 = vsub.f32 %v81_v41, %v82_v39 }
  0x8b   :  { %v87_v43 = vmul.f32 %v86_v40, %v83_v42 }
  0x8d   :  { %160 = vrsqrt.f32 %v87_v43  ;;  %vm95_vm4 = vcmp.eq.f32.partialorder %v87_v43, inf  ;;  %v98_v54 = vand.u32 2147483648, %v87_v43  ;;  %vm97_vm5 = vcmp.eq.f32.partialorder %v87_v43, 0.0 }
  0x92   :  { %v52_v45 = vpop.xlane.xlu2 %51 }
  0x93   :  { %v161_v46 = vpop.eup %160  ;;  %v53_v47 = vadd.f32 %v52_v45, %v50_v44 }
  0x94   :  { %v89_v48 = vmul.f32 %v161_v46, %v87_v43 }
  0x95   :  { %55 = vst.msk [vmem:[#allocation2] sm:$0xff] %vm13_vm3, %v53_v47 }
  0x96   :  { %v90_v49 = vmul.f32 %v161_v46, %v89_v48 }
  0x98   :  { %v91_v50 = vmul.f32 0.5, %v90_v49 }
  0x9a   :  { %v92_v51 = vsub.f32 1.5, %v91_v50 }
  0x9c   :  { %v93_v52 = vmul.f32 %v161_v46, %v92_v51  ;;  %v79_v60 = vld [vmem:[#allocation2] sm:$0xff] }
  0x9d   :  { %v80_v1 = vmul.f32 0.010416667, %v79_v60 }
  0x9e   :  { %v94_v53 = vmul.f32 %v93_v52, %v87_v43 }
  0xa0   :  { %v96_v55 = vsel %vm95_vm4, %v87_v43, %v94_v53 }
  0xa1   :  { %v99_v56 = vsel %vm97_vm5, %v98_v54, %v96_v55 }
  0xa2   :  { %162 = vrcp.f32 %v99_v56  ;;  %v114_v61 = vand.u32 2147483648, %v99_v56  ;;  %v112_v63 = vand.u32 2147483647, %v99_v56  ;;  %vm108_vm7 = vweird.f32 %v99_v56 }
  0xa4   :  { %v115_v3 = vor.u32 1.1754944e-38, %v114_v61  ;;  %vm113_vm9 = vcmp.eq.f32.partialorder %v112_v63, 8.507059e+37 }
  0xa8   :  { %v163_v57 = vpop.eup %162 }
  0xa9   :  { %v104_v58 = vmul.f32 %v163_v57, %v99_v56  ;;  %vm109_vm6 = vweird.f32 %v163_v57 }
  0xaa   :  { %vm110_vm8 = vmor %vm108_vm7, %vm109_vm6 }
  0xab   :  { %v105_v59 = vsub.f32 1.0, %v104_v58 }
  0xad   :  { %v106_v62 = vmul.f32 %v163_v57, %v105_v59 }
  0xaf   :  { %v107_v2 = vadd.f32 %v163_v57, %v106_v62 }
  0xb1   :  { %v111_v4 = vsel %vm110_vm8, %v163_v57, %v107_v2 }
  0xb2   :  { %v116_v5 = vsel %vm113_vm9, %v115_v3, %v111_v4 }
  0xb3   :  { %v117_v6 = vmul.f32 %v116_v5, %v80_v1 }
  0xb5   :  { %v118_v7 = vsel %vm102_vm10, %v117_v6, 0.0 }
  0xb6   :  { %v119_v8 = vsel %vm13_vm3, %v118_v7, 0.0 }
  0xb7   :  { %120 = vadd.xlane.f32.xlu2 %v119_v8 }
 0x12a   :  { %v121_v9 = vpop.xlane.xlu2 %120 }
 0x12b   :  { %v122_v10 = vrot.slane %v121_v9, 4 }
 0x12d   :  { %v123_v11 = vadd.f32 %v122_v10, %v121_v9 }
 0x12f   :  { %v124_v13 = vrot.slane %v123_v11, 2 }
 0x131   :  { %v125_v14 = vadd.f32 %v124_v13, %v123_v11 }
 0x133   :  { %v126_v12 = vrot.slane %v125_v14, 1 }
 0x135   :  { %v127_v15 = vadd.f32 %v126_v12, %v125_v14 }
 0x137   :  { %152 = vpush %v127_v15 }
 0x168   :  { %s153_s18 = spop %152 }
 0x169   :  { %s129_s19 = smul.f32 0.5, %s153_s18 }
 0x16b   :  { %v130_v16 = vstv %s129_s19 }
 0x16c   :  { %132 = vst.msk [vmem:[#allocation7] sm:$0x1] %vm131_vm11, %v130_v16 }
 0x16d   :  { %143 = dma.vmem_to_hbm [thread:$0]  %s139_s14, 16, %s141_s17, [#allocation8]  }
 0x16e   :  { %188 = dma.done.wait [#allocation8], 16  }
 0x16f   :  { %189 = vsyncadd [#allocation8], 4294967280 }
 0x170   :  { %148 = vsyncpa [#allocation8], 1 }

</bundles_post_ra>
